<compile_context>
chip_gen: v7x
topology: tpu7x:2x2x1
jax: 0.10.0
libtpu: 0.0.40
codegen_flags: <defaults>
</compile_context>

<pallas_src>
import math
from functools import partial

import jax
import jax.numpy as jnp
from jax.experimental import pallas as pl
from jax.experimental.pallas import tpu as pltpu


def attn_kernel(n_batch, tok_ref, emb_ref, wqkv_ref, bqkv_ref, wo_ref, bo_ref, o_ref):
    # tok_ref : (R, 1) int32, flat row r = l*N + n   emb_ref : (V, E) f32
    # wqkv_ref: (E, 3E)   bqkv_ref: (1, 3E)   wo_ref: (E, E)   bo_ref: (1, E)
    # o_ref   : (R, E) f32
    R, E = o_ref.shape
    V = emb_ref.shape[0]

    # ---- embedding gather as a one-hot MXU matmul (exact: rows are 0/1) --------------
    tok = tok_ref[...]                                                    # (R, 1) int32
    vocab_iota = jax.lax.broadcasted_iota(jnp.int32, (R, V), 1)           # (R, V)
    onehot = (tok == vocab_iota).astype(jnp.float32)                      # (R, V)
    x = jnp.dot(onehot, emb_ref[...], preferred_element_type=jnp.float32)  # (R, E)

    # ---- fused QKV projection (1/sqrt(E) already folded into Wq/bq) ------------------
    qkv = jnp.dot(x, wqkv_ref[...], preferred_element_type=jnp.float32) + bqkv_ref[...]
    q = qkv[:, :E]
    k = qkv[:, E:2 * E]
    v = qkv[:, 2 * E:]

    # ---- batched attention with block-diagonal mask (rows of different n can't mix) --
    s = jnp.einsum('qd,kd->qk', q, k, preferred_element_type=jnp.float32)  # (R, R)
    row_b = jax.lax.broadcasted_iota(jnp.int32, (R, R), 0) % n_batch
    col_b = jax.lax.broadcasted_iota(jnp.int32, (R, R), 1) % n_batch
    s = jnp.where(row_b == col_b, s, -1e30)
    m = jnp.max(s, axis=-1, keepdims=True)
    p = jnp.exp(s - m)                                                     # masked -> 0
    attn = p * pl.reciprocal(jnp.sum(p, axis=-1, keepdims=True), approx=False)
    ctx = jnp.dot(attn, v, preferred_element_type=jnp.float32)             # (R, E)

    # ---- output projection + sigmoid, one dense (R, E) store -------------------------
    out = jnp.dot(ctx, wo_ref[...], preferred_element_type=jnp.float32) + bo_ref[...]
    o_ref[...] = jax.nn.sigmoid(out).astype(o_ref.dtype)


def attention_sentiment_forward(tokens, params):
    """tokens: (L, N) integer ids. Returns (L, N, E) float32, matching PyTorch layout."""
    tokens = tokens.astype(jnp.int32)                        # x.type(torch.LongTensor)
    L, N = tokens.shape
    V, E = params["embedding"].shape
    R = L * N
    scale = 1.0 / math.sqrt(E)

    # PyTorch packs in_proj as (3E, E) = [Wq; Wk; Wv] with y = x @ W.T.
    Wq, Wk, Wv = jnp.split(params["in_proj_weight"], 3, axis=0)
    bq, bk, bv = jnp.split(params["in_proj_bias"], 3, axis=0)
    wqkv = jnp.concatenate([Wq.T * scale, Wk.T, Wv.T], axis=1)               # (E, 3E)
    bqkv = jnp.concatenate([bq * scale, bk, bv], axis=0).reshape(1, 3 * E)   # (1, 3E)
    wo = params["out_proj_weight"].T                                         # (E, E)
    bo = params["out_proj_bias"].reshape(1, E)                               # (1, E)

    tok2d = tokens.reshape(R, 1)                             # flat row r = l*N + n

    out2d = pl.pallas_call(
        partial(attn_kernel, N),
        out_shape=jax.ShapeDtypeStruct((R, E), jnp.float32),
        grid=(1,),                                           # whole problem in one step
        in_specs=[
            pl.BlockSpec((R, 1), lambda i: (0, 0)),          # token ids (VMEM)
            pl.BlockSpec((V, E), lambda i: (0, 0)),          # embedding table
            pl.BlockSpec((E, 3 * E), lambda i: (0, 0)),      # fused Wqkv^T (Q pre-scaled)
            pl.BlockSpec((1, 3 * E), lambda i: (0, 0)),      # fused bqkv
            pl.BlockSpec((E, E), lambda i: (0, 0)),          # Wo^T
            pl.BlockSpec((1, E), lambda i: (0, 0)),          # bo
        ],
        out_specs=pl.BlockSpec((R, E), lambda i: (0, 0)),    # lane/sublane-dense (16,128)
        compiler_params=pltpu.CompilerParams(dimension_semantics=("arbitrary",)),
    )(tok2d, params["embedding"], wqkv, bqkv, wo, bo)

    # row-major reshape back to PyTorch's (L, N, E) layout — metadata only, no transpose
    return out2d.reshape(L, N, E)


def reference_forward(tokens, params):
    """Pure-JAX reference mirroring torch.nn.MultiheadAttention (num_heads=1)."""
    tokens = tokens.astype(jnp.int32)
    emb = params["embedding"][tokens]                        # (L, N, E)
    L, N, E = emb.shape
    Wq, Wk, Wv = jnp.split(params["in_proj_weight"], 3, axis=0)
    bq, bk, bv = jnp.split(params["in_proj_bias"], 3, axis=0)
    q = jnp.transpose(emb @ Wq.T + bq, (1, 0, 2))            # (N, L, E)
    k = jnp.transpose(emb @ Wk.T + bk, (1, 0, 2))
    v = jnp.transpose(emb @ Wv.T + bv, (1, 0, 2))
    s = jnp.einsum("nqd,nkd->nqk", q, k) / math.sqrt(E)
    a = jax.nn.softmax(s, axis=-1)
    ctx = jnp.einsum("nqk,nkd->nqd", a, v)
    out = ctx @ params["out_proj_weight"].T + params["out_proj_bias"]
    return jax.nn.sigmoid(jnp.transpose(out, (1, 0, 2)))


def init_params(key, vocab_size, embedding_dim):
    k_emb, k_inw, k_inb, k_ow, k_ob = jax.random.split(key, 5)
    E = embedding_dim
    return {
        "embedding": jax.random.normal(k_emb, (vocab_size, E), jnp.float32),
        "in_proj_weight": jax.random.normal(k_inw, (3 * E, E), jnp.float32) * 0.05,
        "in_proj_bias": jax.random.normal(k_inb, (3 * E,), jnp.float32) * 0.05,
        "out_proj_weight": jax.random.normal(k_ow, (E, E), jnp.float32) * 0.05,
        "out_proj_bias": jax.random.normal(k_ob, (E,), jnp.float32) * 0.05,
    }


if __name__ == "__main__":
    # Small shapes consistent with the module: seq L=8, batch N=2, embed E=128, vocab=256.
    L, N, E, VOCAB = 8, 2, 128, 256

    key = jax.random.PRNGKey(0)
    k_tok, k_par = jax.random.split(key)
    tokens = jax.random.randint(k_tok, (L, N), 0, VOCAB, dtype=jnp.int32)
    params = init_params(k_par, VOCAB, E)

    fwd = jax.jit(attention_sentiment_forward)
    y = jax.block_until_ready(fwd(tokens, params))

    y_ref = reference_forward(tokens, params)
    assert y.shape == (L, N, E)
    assert jnp.allclose(y, y_ref, atol=1e-5, rtol=1e-5), "mismatch vs pure-JAX reference"

    print("KERNEL_OK")
</pallas_src>

<mosaic_0001>
module attributes {stable_mosaic.version = 11 : i64} {
  func.func @attn_kernel(%arg0: i32, %arg1: memref<16x1xi32, #tpu.memory_space<vmem>>, %arg2: memref<256x128xf32, #tpu.memory_space<vmem>>, %arg3: memref<128x384xf32, #tpu.memory_space<vmem>>, %arg4: memref<1x384xf32, #tpu.memory_space<vmem>>, %arg5: memref<128x128xf32, #tpu.memory_space<vmem>>, %arg6: memref<1x128xf32, #tpu.memory_space<vmem>>, %arg7: memref<16x128xf32, #tpu.memory_space<vmem>>) attributes {dimension_semantics = [#tpu.dimension_semantics<arbitrary>], iteration_bounds = array<i64: 1>, scalar_prefetch = 0 : i64, scratch_operands = 0 : i64, tpu.core_type = #tpu.core_type<tc>, window_params = [{pipeline_mode = #tpu.pipeline_mode<synchronous>, transform_indices = @transform_0, window_bounds = array<i64: 16, 1>}, {pipeline_mode = #tpu.pipeline_mode<synchronous>, transform_indices = @transform_1, window_bounds = array<i64: 256, 128>}, {pipeline_mode = #tpu.pipeline_mode<synchronous>, transform_indices = @transform_2, window_bounds = array<i64: 128, 384>}, {pipeline_mode = #tpu.pipeline_mode<synchronous>, transform_indices = @transform_3, window_bounds = array<i64: 1, 384>}, {pipeline_mode = #tpu.pipeline_mode<synchronous>, transform_indices = @transform_4, window_bounds = array<i64: 128, 128>}, {pipeline_mode = #tpu.pipeline_mode<synchronous>, transform_indices = @transform_5, window_bounds = array<i64: 1, 128>}, {pipeline_mode = #tpu.pipeline_mode<synchronous>, transform_indices = @transform_6, window_bounds = array<i64: 16, 128>}]} {
    %c0 = arith.constant 0 : index
    %c0_0 = arith.constant 0 : index
    %0 = vector.load %arg1[%c0, %c0_0] : memref<16x1xi32, #tpu.memory_space<vmem>>, vector<16x1xi32>
    %1 = tpu.iota {dimensions = array<i32: 1>} : vector<16x256xi32>
    %2 = vector.broadcast %0 : vector<16x1xi32> to vector<16x256xi32>
    %3 = arith.cmpi eq, %2, %1 : vector<16x256xi32>
    %4 = arith.extui %3 : vector<16x256xi1> to vector<16x256xi32>
    %5 = arith.sitofp %4 : vector<16x256xi32> to vector<16x256xf32>
    %c0_1 = arith.constant 0 : index
    %c0_2 = arith.constant 0 : index
    %6 = vector.load %arg2[%c0_1, %c0_2] : memref<256x128xf32, #tpu.memory_space<vmem>>, vector<256x128xf32>
    %cst = arith.constant dense<0.000000e+00> : vector<16x128xf32>
    %7 = tpu.matmul %5, %6, %cst {dimension_numbers = #tpu.dot_dimension_numbers<[1], [0], [0], [1], [0, 0, 1, 1], [], []>} : vector<16x256xf32>, vector<256x128xf32>, vector<16x128xf32> -> vector<16x128xf32>
    %c0_3 = arith.constant 0 : index
    %c0_4 = arith.constant 0 : index
    %8 = vector.load %arg3[%c0_3, %c0_4] : memref<128x384xf32, #tpu.memory_space<vmem>>, vector<128x384xf32>
    %cst_5 = arith.constant dense<0.000000e+00> : vector<16x384xf32>
    %9 = tpu.matmul %7, %8, %cst_5 {dimension_numbers = #tpu.dot_dimension_numbers<[1], [0], [0], [1], [0, 0, 1, 1], [], []>} : vector<16x128xf32>, vector<128x384xf32>, vector<16x384xf32> -> vector<16x384xf32>
    %c0_6 = arith.constant 0 : index
    %c0_7 = arith.constant 0 : index
    %10 = vector.load %arg4[%c0_6, %c0_7] : memref<1x384xf32, #tpu.memory_space<vmem>>, vector<1x384xf32>
    %11 = vector.broadcast %10 : vector<1x384xf32> to vector<16x384xf32>
    %12 = arith.addf %9, %11 : vector<16x384xf32>
    %13 = vector.extract_strided_slice %12 {offsets = [0, 0], sizes = [16, 128], strides = [1, 1]} : vector<16x384xf32> to vector<16x128xf32>
    %14 = vector.extract_strided_slice %12 {offsets = [0, 128], sizes = [16, 128], strides = [1, 1]} : vector<16x384xf32> to vector<16x128xf32>
    %15 = vector.extract_strided_slice %12 {offsets = [0, 256], sizes = [16, 128], strides = [1, 1]} : vector<16x384xf32> to vector<16x128xf32>
    "tpu.trace_start"() <{level = 10 : i32, message = "qd,kd->qk"}> : () -> ()
    %cst_8 = arith.constant dense<0.000000e+00> : vector<16x16xf32>
    %16 = tpu.matmul %13, %14, %cst_8 {dimension_numbers = #tpu.dot_dimension_numbers<[1], [1], [0], [0], [0, 0, 1, 0], [], []>} : vector<16x128xf32>, vector<16x128xf32>, vector<16x16xf32> -> vector<16x16xf32>
    "tpu.trace_stop"() : () -> ()
    %17 = tpu.iota {dimensions = array<i32: 0>} : vector<16x16xi32>
    %c2_i32 = arith.constant 2 : i32
    %c0_i32 = arith.constant 0 : i32
    %18 = arith.cmpi eq, %c2_i32, %c0_i32 : i32
    %c1_i32 = arith.constant 1 : i32
    %19 = arith.select %18, %c1_i32, %c2_i32 : i32
    %20 = vector.broadcast %19 : i32 to vector<16x16xi32>
    %21 = arith.remsi %17, %20 : vector<16x16xi32>
    %c0_i32_9 = arith.constant 0 : i32
    %22 = vector.broadcast %c0_i32_9 : i32 to vector<16x16xi32>
    %23 = arith.cmpi ne, %21, %22 : vector<16x16xi32>
    %c0_i32_10 = arith.constant 0 : i32
    %24 = vector.broadcast %c0_i32_10 : i32 to vector<16x16xi32>
    %25 = arith.cmpi slt, %21, %24 : vector<16x16xi32>
    %c0_i32_11 = arith.constant 0 : i32
    %26 = arith.cmpi slt, %19, %c0_i32_11 : i32
    %27 = vector.broadcast %26 : i1 to vector<16x16xi1>
    %28 = vector.broadcast %27 : vector<16x16xi1> to vector<16x16xi1>
    %29 = arith.xori %25, %28 : vector<16x16xi1>
    %30 = arith.andi %29, %23 : vector<16x16xi1>
    %31 = vector.broadcast %19 : i32 to vector<16x16xi32>
    %32 = arith.addi %21, %31 : vector<16x16xi32>
    %33 = arith.select %30, %32, %21 : vector<16x16xi1>, vector<16x16xi32>
    %34 = tpu.iota {dimensions = array<i32: 1>} : vector<16x16xi32>
    %c2_i32_12 = arith.constant 2 : i32
    %c0_i32_13 = arith.constant 0 : i32
    %35 = arith.cmpi eq, %c2_i32_12, %c0_i32_13 : i32
    %c1_i32_14 = arith.constant 1 : i32
    %36 = arith.select %35, %c1_i32_14, %c2_i32_12 : i32
    %37 = vector.broadcast %36 : i32 to vector<16x16xi32>
    %38 = arith.remsi %34, %37 : vector<16x16xi32>
    %c0_i32_15 = arith.constant 0 : i32
    %39 = vector.broadcast %c0_i32_15 : i32 to vector<16x16xi32>
    %40 = arith.cmpi ne, %38, %39 : vector<16x16xi32>
    %c0_i32_16 = arith.constant 0 : i32
    %41 = vector.broadcast %c0_i32_16 : i32 to vector<16x16xi32>
    %42 = arith.cmpi slt, %38, %41 : vector<16x16xi32>
    %c0_i32_17 = arith.constant 0 : i32
    %43 = arith.cmpi slt, %36, %c0_i32_17 : i32
    %44 = vector.broadcast %43 : i1 to vector<16x16xi1>
    %45 = vector.broadcast %44 : vector<16x16xi1> to vector<16x16xi1>
    %46 = arith.xori %42, %45 : vector<16x16xi1>
    %47 = arith.andi %46, %40 : vector<16x16xi1>
    %48 = vector.broadcast %36 : i32 to vector<16x16xi32>
    %49 = arith.addi %38, %48 : vector<16x16xi32>
    %50 = arith.select %47, %49, %38 : vector<16x16xi1>, vector<16x16xi32>
    %51 = arith.cmpi eq, %33, %50 : vector<16x16xi32>
    %cst_18 = arith.constant -1.000000e+30 : f32
    %52 = vector.broadcast %cst_18 : f32 to vector<16x16xf32>
    %53 = arith.select %51, %16, %52 : vector<16x16xi1>, vector<16x16xf32>
    %cst_19 = arith.constant dense<0xFF800000> : vector<16xf32>
    %54 = vector.multi_reduction <maximumf>, %53, %cst_19 [1] : vector<16x16xf32> to vector<16xf32>
    %55 = vector.shape_cast %54 : vector<16xf32> to vector<16x1xf32>
    %56 = vector.broadcast %55 : vector<16x1xf32> to vector<16x16xf32>
    %57 = arith.subf %53, %56 : vector<16x16xf32>
    %58 = math.exp %57 : vector<16x16xf32>
    %cst_20 = arith.constant dense<0.000000e+00> : vector<16xf32>
    %59 = vector.multi_reduction <add>, %58, %cst_20 [1] : vector<16x16xf32> to vector<16xf32>
    %60 = vector.shape_cast %59 : vector<16xf32> to vector<16x1xf32>
    %61 = tpu.reciprocal %60 : vector<16x1xf32> -> vector<16x1xf32>
    %62 = vector.broadcast %61 : vector<16x1xf32> to vector<16x16xf32>
    %63 = arith.mulf %58, %62 : vector<16x16xf32>
    %cst_21 = arith.constant dense<0.000000e+00> : vector<16x128xf32>
    %64 = tpu.matmul %63, %15, %cst_21 {dimension_numbers = #tpu.dot_dimension_numbers<[1], [0], [0], [1], [0, 0, 1, 1], [], []>} : vector<16x16xf32>, vector<16x128xf32>, vector<16x128xf32> -> vector<16x128xf32>
    %c0_22 = arith.constant 0 : index
    %c0_23 = arith.constant 0 : index
    %65 = vector.load %arg5[%c0_22, %c0_23] : memref<128x128xf32, #tpu.memory_space<vmem>>, vector<128x128xf32>
    %cst_24 = arith.constant dense<0.000000e+00> : vector<16x128xf32>
    %66 = tpu.matmul %64, %65, %cst_24 {dimension_numbers = #tpu.dot_dimension_numbers<[1], [0], [0], [1], [0, 0, 1, 1], [], []>} : vector<16x128xf32>, vector<128x128xf32>, vector<16x128xf32> -> vector<16x128xf32>
    %c0_25 = arith.constant 0 : index
    %c0_26 = arith.constant 0 : index
    %67 = vector.load %arg6[%c0_25, %c0_26] : memref<1x128xf32, #tpu.memory_space<vmem>>, vector<1x128xf32>
    %68 = vector.broadcast %67 : vector<1x128xf32> to vector<16x128xf32>
    %69 = arith.addf %66, %68 : vector<16x128xf32>
    %70 = arith.negf %69 : vector<16x128xf32>
    %71 = math.exp %70 : vector<16x128xf32>
    %cst_27 = arith.constant 1.000000e+00 : f32
    %72 = vector.broadcast %cst_27 : f32 to vector<16x128xf32>
    %73 = arith.addf %72, %71 : vector<16x128xf32>
    %74 = arith.divf %72, %73 : vector<16x128xf32>
    %c0_28 = arith.constant 0 : index
    %c0_29 = arith.constant 0 : index
    %75 = vector.load %arg7[%c0_28, %c0_29] : memref<16x128xf32, #tpu.memory_space<vmem>>, vector<16x128xf32>
    tpu.vector_store %arg7[%c0_28, %c0_29], %74 {strides = array<i32>} : memref<16x128xf32, #tpu.memory_space<vmem>>, vector<16x128xf32>,
    return
  }
  func.func @transform_0(%arg0: i32) -> (i32, i32) {
    %c0_i32 = arith.constant 0 : i32
    %c0_i32_0 = arith.constant 0 : i32
    %c0_i32_1 = arith.constant 0 : i32
    return %c0_i32, %c0_i32_0 : i32, i32
  }
  func.func @transform_1(%arg0: i32) -> (i32, i32) {
    %c0_i32 = arith.constant 0 : i32
    %c0_i32_0 = arith.constant 0 : i32
    %c0_i32_1 = arith.constant 0 : i32
    return %c0_i32, %c0_i32_0 : i32, i32
  }
  func.func @transform_2(%arg0: i32) -> (i32, i32) {
    %c0_i32 = arith.constant 0 : i32
    %c0_i32_0 = arith.constant 0 : i32
    %c0_i32_1 = arith.constant 0 : i32
    return %c0_i32, %c0_i32_0 : i32, i32
  }
  func.func @transform_3(%arg0: i32) -> (i32, i32) {
    %c0_i32 = arith.constant 0 : i32
    %c0_i32_0 = arith.constant 0 : i32
    %c0_i32_1 = arith.constant 0 : i32
    return %c0_i32, %c0_i32_0 : i32, i32
  }
  func.func @transform_4(%arg0: i32) -> (i32, i32) {
    %c0_i32 = arith.constant 0 : i32
    %c0_i32_0 = arith.constant 0 : i32
    %c0_i32_1 = arith.constant 0 : i32
    return %c0_i32, %c0_i32_0 : i32, i32
  }
  func.func @transform_5(%arg0: i32) -> (i32, i32) {
    %c0_i32 = arith.constant 0 : i32
    %c0_i32_0 = arith.constant 0 : i32
    %c0_i32_1 = arith.constant 0 : i32
    return %c0_i32, %c0_i32_0 : i32, i32
  }
  func.func @transform_6(%arg0: i32) -> (i32, i32) {
    %c0_i32 = arith.constant 0 : i32
    %c0_i32_0 = arith.constant 0 : i32
    %c0_i32_1 = arith.constant 0 : i32
    return %c0_i32, %c0_i32_0 : i32, i32
  }
}

</mosaic_0001>

<bundles_post_ra>
// kernel: attention_sentiment_forward.1
= control target key start
LH: loop header
LB: loop body
LE: loop exit
PB: predicated region body
PF: predicated region fallthrough
CT: control target
= control target key end

     0   :  { %v1083_v2 = vmov 0   ;;  %s1450_s0 = inlined_call_operand.vmem [shape: s32[16,1], index: 0, kind: input, shape index: {}]   ;;  %s1451_s1 = inlined_call_operand.vmem [shape: f32[256,128], index: 1, kind: input, shape index: {}]   ;;  %s1452_s2 = inlined_call_operand.vmem [shape: f32[128,384], index: 2, kind: input, shape index: {}]   ;;  %s1453_s3 = inlined_call_operand.vmem [shape: f32[1,384], index: 3, kind: input, shape index: {}]   ;;  %s1454_s4 = inlined_call_operand.vmem [shape: f32[128,128], index: 4, kind: input, shape index: {}]   ;;  %s1455_s5 = inlined_call_operand.vmem [shape: f32[1,128], index: 5, kind: input, shape index: {}]   ;;  %s1456_s6 = inlined_call_operand.hbm [shape: f32[16,128], index: 6, kind: output, shape index: {}]  }
   0x1   :  { %v24_v0 = vld [vmem:[%s1450_s0] sm:$0xff]  ;;  %1042 = vset.pattern.permute.xlu0 %v1083_v2  ;;  %v25_v3 = vld [vmem:[%s1450_s0 + $0x8] sm:$0xff]  ;;  %v65_v9 = vld [vmem:[%s1451_s1 + $0x90] sm:$0xff] }
   0x2   :  { %v63_v1 = vld [vmem:[%s1451_s1 + $0x80] sm:$0xff]  ;;  %v64_v4 = vld [vmem:[%s1451_s1 + $0x88] sm:$0xff]  ;;  %30 = vperm.xlu0 %1042, %v24_v0   ;;  %v66_v10 = vld [vmem:[%s1451_s1 + $0x98] sm:$0xff] }
   0x3   :  { %v47_v5 = vld [vmem:[%s1451_s1] sm:$0xff]  ;;  %v48_v6 = vld [vmem:[%s1451_s1 + $0x8] sm:$0xff]  ;;  %v900_v7 = vpack.c.bf16 %v64_v4, %v63_v1  ;;  %v49_v11 = vld [vmem:[%s1451_s1 + $0x10] sm:$0xff]  ;;  %v904_v12 = vpack.c.bf16 %v66_v10, %v65_v9 }
   0x4   :  { %v902_v8 = vpack.c.bf16 %v48_v6, %v47_v5  ;;  %v50_v13 = vld [vmem:[%s1451_s1 + $0x18] sm:$0xff]  ;;  %v67_v14 = vld [vmem:[%s1451_s1 + $0xa0] sm:$0xff]  ;;  %v68_v15 = vld [vmem:[%s1451_s1 + $0xa8] sm:$0xff] }
   0x5   :  { %901 = vmatprep.subr.bf16.mxu0 %v900_v7  ;;  %v906_v16 = vpack.c.bf16 %v50_v13, %v49_v11  ;;  %v908_v17 = vpack.c.bf16 %v68_v15, %v67_v14  ;;  %v51_v18 = vld [vmem:[%s1451_s1 + $0x20] sm:$0xff]  ;;  %v52_v19 = vld [vmem:[%s1451_s1 + $0x28] sm:$0xff]  ;;  %v69_v20 = vld [vmem:[%s1451_s1 + $0xb0] sm:$0xff] }
   0x6   :  { %903 = vmatpush3.bf16.msra.mxu0 %v902_v8  ;;  %33 = vperm.xlu0 %1042, %v25_v3   ;;  %v70_v21 = vld [vmem:[%s1451_s1 + $0xb8] sm:$0xff]  ;;  %v910_v22 = vpack.c.bf16 %v52_v19, %v51_v18  ;;  %v53_v24 = vld [vmem:[%s1451_s1 + $0x30] sm:$0xff]  ;;  %v71_v26 = vld [vmem:[%s1451_s1 + $0xc0] sm:$0xff] }
   0x7   :  { %905 = vmatprep.subr.bf16.mxu0 %v904_v12  ;;  %v912_v23 = vpack.c.bf16 %v70_v21, %v69_v20  ;;  %v54_v25 = vld [vmem:[%s1451_s1 + $0x38] sm:$0xff]  ;;  %v72_v27 = vld [vmem:[%s1451_s1 + $0xc8] sm:$0xff]  ;;  %v158_v29 = vld [vmem:[%s1452_s2 + $0x20] sm:$0xff] }
   0x8   :  { %v155_v28 = vld [vmem:[%s1452_s2 + $0x8] sm:$0xff]  ;;  %v154_v31 = vld [vmem:[%s1452_s2] sm:$0xff]  ;;  %v157_v32 = vld [vmem:[%s1452_s2 + $0x18] sm:$0xff]  ;;  %v914_v34 = vpack.c.bf16 %v54_v25, %v53_v24  ;;  %v916_v39 = vpack.c.bf16 %v72_v27, %v71_v26 }
   0x9   :  { %v932_v30 = vpack.c.bf16 %v158_v29, %v155_v28  ;;  %v161_v33 = vld [vmem:[%s1452_s2 + $0x38] sm:$0xff]  ;;  %v55_v35 = vld [vmem:[%s1451_s1 + $0x40] sm:$0xff]  ;;  %v56_v36 = vld [vmem:[%s1451_s1 + $0x48] sm:$0xff]  ;;  %v934_v37 = vpack.c.bf16 %v157_v32, %v154_v31 }
   0xa   :  { %907 = vmatpush3.bf16.msra.mxu0 %v906_v16  ;;  %v164_v38 = vld [vmem:[%s1452_s2 + $0x50] sm:$0xff]  ;;  %v163_v42 = vld [vmem:[%s1452_s2 + $0x48] sm:$0xff]  ;;  %v74_v45 = vld [vmem:[%s1451_s1 + $0xd8] sm:$0xff]  ;;  %v918_v51 = vpack.c.bf16 %v56_v36, %v55_v35 }
   0xb   :  { %909 = vmatprep.subr.bf16.mxu0 %v908_v17  ;;  %933 = vmatprep.subr.bf16.mxu1 %v932_v30  ;;  %v936_v40 = vpack.c.bf16 %v164_v38, %v161_v33  ;;  %v160_v41 = vld [vmem:[%s1452_s2 + $0x30] sm:$0xff]  ;;  %v167_v43 = vld [vmem:[%s1452_s2 + $0x68] sm:$0xff]  ;;  %v170_v47 = vld [vmem:[%s1452_s2 + $0x80] sm:$0xff] }
   0xc   :  { %v73_v44 = vld [vmem:[%s1451_s1 + $0xd0] sm:$0xff]  ;;  %935 = vmatpush1.bf16.msra.mxu1 %v934_v37  ;;  %v938_v46 = vpack.c.bf16 %v163_v42, %v160_v41  ;;  %v940_v48 = vpack.c.bf16 %v170_v47, %v167_v43  ;;  %v166_v49 = vld [vmem:[%s1452_s2 + $0x60] sm:$0xff]  ;;  %v169_v50 = vld [vmem:[%s1452_s2 + $0x78] sm:$0xff] }
   0xd   :  { %937 = vmatprep.subr.bf16.mxu1 %v936_v40  ;;  %v173_v52 = vld [vmem:[%s1452_s2 + $0x98] sm:$0xff]  ;;  %v176_v53 = vld [vmem:[%s1452_s2 + $0xb0] sm:$0xff]  ;;  %v920_v54 = vpack.c.bf16 %v74_v45, %v73_v44  ;;  %v75_v57 = vld [vmem:[%s1451_s1 + $0xe0] sm:$0xff]  ;;  %v942_v59 = vpack.c.bf16 %v169_v50, %v166_v49 }
   0xe   :  { %911 = vmatpush3.bf16.msra.mxu0 %v910_v22  ;;  %v57_v55 = vld [vmem:[%s1451_s1 + $0x50] sm:$0xff]  ;;  %v58_v56 = vld [vmem:[%s1451_s1 + $0x58] sm:$0xff]  ;;  %v76_v58 = vld [vmem:[%s1451_s1 + $0xe8] sm:$0xff]  ;;  %v944_v60 = vpack.c.bf16 %v176_v53, %v173_v52 }
   0xf   :  { %913 = vmatprep.subr.bf16.mxu0 %v912_v23  ;;  %v172_v61 = vld [vmem:[%s1452_s2 + $0x90] sm:$0xff]  ;;  %v175_v62 = vld [vmem:[%s1452_s2 + $0xa8] sm:$0xff]  ;;  %v922_v63 = vpack.c.bf16 %v58_v56, %v57_v55  ;;  %v182_v1 = vld [vmem:[%s1452_s2 + $0xe0] sm:$0xff]  ;;  %v924_v2 = vpack.c.bf16 %v76_v58, %v75_v57 }
  0x10   :  { %939 = vmatpush1.bf16.msra.mxu1 %v938_v46  ;;  %v179_v0 = vld [vmem:[%s1452_s2 + $0xc8] sm:$0xff]  ;;  %v59_v3 = vld [vmem:[%s1451_s1 + $0x60] sm:$0xff]  ;;  %v77_v5 = vld [vmem:[%s1451_s1 + $0xf0] sm:$0xff]  ;;  %v946_v7 = vpack.c.bf16 %v175_v62, %v172_v61 }
  0x11   :  { %941 = vmatprep.subr.bf16.mxu1 %v940_v48  ;;  %v60_v4 = vld [vmem:[%s1451_s1 + $0x68] sm:$0xff]  ;;  %v78_v6 = vld [vmem:[%s1451_s1 + $0xf8] sm:$0xff]  ;;  %v948_v8 = vpack.c.bf16 %v182_v1, %v179_v0  ;;  %v178_v9 = vld [vmem:[%s1452_s2 + $0xc0] sm:$0xff] }
  0x12   :  { %915 = vmatpush3.bf16.msra.mxu0 %v914_v34  ;;  %v181_v10 = vld [vmem:[%s1452_s2 + $0xd8] sm:$0xff] }
  0x13   :  { %917 = vmatprep.subr.bf16.mxu0 %v916_v39 }
  0x14   :  { %943 = vmatpush1.bf16.msra.mxu1 %v942_v59 }
  0x15   :  { %945 = vmatprep.subr.bf16.mxu1 %v944_v60 }
  0x16   :  { %919 = vmatpush3.bf16.msra.mxu0 %v918_v51 }
  0x17   :  { %921 = vmatprep.subr.bf16.mxu0 %v920_v54 }
  0x18   :  { %11 = vsyncpa [#allocation3], 0  ;;  %v926_v11 = vpack.c.bf16 %v60_v4, %v59_v3  ;;  %v185_v12 = vld [vmem:[%s1452_s2 + $0xf8] sm:$0xff]  ;;  %v188_v13 = vld [vmem:[%s1452_s2 + $0x110] sm:$0xff]  ;;  %v928_v14 = vpack.c.bf16 %v78_v6, %v77_v5  ;;  %947 = vmatpush1.bf16.msra.mxu1 %v946_v7  ;;  %v950_v19 = vpack.c.bf16 %v181_v10, %v178_v9  ;;  %v26_v32 = vlaneseq }
  0x19   :  { %v61_v15 = vld [vmem:[%s1451_s1 + $0x70] sm:$0xff]  ;;  %v62_v16 = vld [vmem:[%s1451_s1 + $0x78] sm:$0xff]  ;;  %v159_v18 = vld [vmem:[%s1452_s2 + $0x28] sm:$0xff]  ;;  %949 = vmatprep.subr.bf16.mxu1 %v948_v8  ;;  %v952_v20 = vpack.c.bf16 %v188_v13, %v185_v12  ;;  %v1084_v39 = vmov 1.0   ;;  %v1085_v1 = vmov 0.0   ;;  %vm489_vm5 = vcmask 130048  }
  0x1a   :  { %923 = vmatpush3.bf16.msra.mxu0 %v922_v63  ;;  %v156_v17 = vld [vmem:[%s1452_s2 + $0x10] sm:$0xff]  ;;  %v187_v22 = vld [vmem:[%s1452_s2 + $0x108] sm:$0xff]  ;;  %v930_v23 = vpack.c.bf16 %v62_v16, %v61_v15  ;;  %v194_v25 = vld [vmem:[%s1452_s2 + $0x140] sm:$0xff]  ;;  %v1317_v33 = vand.u32 127, %v26_v32  ;;  %283 = vmatprep.mubr.f32.mxu1 %v1085_v1  ;;  %v205_v8 = vshrl.u32 %v26_v32, 7 }
  0x1b   :  { %925 = vmatprep.subr.bf16.mxu0 %v924_v2  ;;  %v184_v21 = vld [vmem:[%s1452_s2 + $0xf0] sm:$0xff]  ;;  %v191_v24 = vld [vmem:[%s1452_s2 + $0x128] sm:$0xff]  ;;  %v964_v26 = vpack.c.bf16 %v159_v18, %v156_v17  ;;  %v190_v29 = vld [vmem:[%s1452_s2 + $0x120] sm:$0xff] }
  0x1c   :  { %951 = vmatpush1.bf16.msra.mxu1 %v950_v19  ;;  %v954_v27 = vpack.c.bf16 %v187_v22, %v184_v21  ;;  %v956_v28 = vpack.c.bf16 %v194_v25, %v191_v24  ;;  %v193_v30 = vld [vmem:[%s1452_s2 + $0x138] sm:$0xff]  ;;  %v28_v34 = vadd.s32 128, %v1317_v33  ;;  %v162_v35 = vld [vmem:[%s1452_s2 + $0x40] sm:$0xff]  ;;  %v168_v40 = vld [vmem:[%s1452_s2 + $0x70] sm:$0xff]  ;;  %v206_v9 = vsub.s32 0, %v205_v8 }
  0x1d   :  { %953 = vmatprep.subr.bf16.mxu1 %v952_v20  ;;  %v958_v31 = vpack.c.bf16 %v193_v30, %v190_v29  ;;  %v165_v36 = vld [vmem:[%s1452_s2 + $0x58] sm:$0xff]  ;;  %v171_v41 = vld [vmem:[%s1452_s2 + $0x88] sm:$0xff]  ;;  %v174_v44 = vld [vmem:[%s1452_s2 + $0xa0] sm:$0xff]  ;;  %v214_v12 = vsub.s32 2, %v205_v8  ;;  %v210_v13 = vsub.s32 1, %v205_v8  ;;  %v448_v30 = vadd.s32 8, %v205_v8 }
  0x1e   :  { %927 = vmatpush3.bf16.msra.mxu0 %v926_v11  ;;  %v968_v38 = vpack.c.bf16 %v165_v36, %v162_v35  ;;  %v972_v43 = vpack.c.bf16 %v171_v41, %v168_v40  ;;  %v177_v45 = vld [vmem:[%s1452_s2 + $0xb8] sm:$0xff]  ;;  %v180_v47 = vld [vmem:[%s1452_s2 + $0xd0] sm:$0xff]  ;;  %v183_v48 = vld [vmem:[%s1452_s2 + $0xe8] sm:$0xff]  ;;  %v453_v32 = vand.u32 1, %v205_v8 }
  0x1f   :  { %929 = vmatprep.subr.bf16.mxu0 %v928_v14  ;;  %v976_v46 = vpack.c.bf16 %v177_v45, %v174_v44  ;;  %v980_v49 = vpack.c.bf16 %v183_v48, %v180_v47  ;;  %v186_v50 = vld [vmem:[%s1452_s2 + $0x100] sm:$0xff]  ;;  %v189_v51 = vld [vmem:[%s1452_s2 + $0x118] sm:$0xff]  ;;  %v200_v54 = vld [vmem:[%s1452_s2 + $0x170] sm:$0xff] }
  0x20   :  { %955 = vmatpush1.bf16.msra.mxu1 %v954_v27  ;;  %v984_v52 = vpack.c.bf16 %v189_v51, %v186_v50  ;;  %v197_v53 = vld [vmem:[%s1452_s2 + $0x158] sm:$0xff]  ;;  %v192_v55 = vld [vmem:[%s1452_s2 + $0x130] sm:$0xff]  ;;  %v195_v57 = vld [vmem:[%s1452_s2 + $0x148] sm:$0xff] }
  0x21   :  { %957 = vmatprep.subr.bf16.mxu1 %v956_v28  ;;  %v960_v56 = vpack.c.bf16 %v200_v54, %v197_v53  ;;  %v196_v58 = vld [vmem:[%s1452_s2 + $0x150] sm:$0xff]  ;;  %v199_v59 = vld [vmem:[%s1452_s2 + $0x168] sm:$0xff]  ;;  %v988_v60 = vpack.c.bf16 %v195_v57, %v192_v55  ;;  %v198_v62 = vld [vmem:[%s1452_s2 + $0x160] sm:$0xff] }
  0x22   :  { %931 = vmatpush3.bf16.msra.mxu0 %v930_v23  ;;  %v962_v61 = vpack.c.bf16 %v199_v59, %v196_v58  ;;  %v201_v63 = vld [vmem:[%s1452_s2 + $0x178] sm:$0xff]  ;;  %v202_v10 = vld [vmem:[%s1453_s3] sm:$0x7]  ;;  %v594_v51 = vld [vmem:[%s1454_s4 + $0x8] sm:$0xff] }
  0x23   :  { %965 = vmatprep.subr.bf16.mxu0 %v964_v26  ;;  %v992_v0 = vpack.c.bf16 %v201_v63, %v198_v62  ;;  %v207_v11 = vrot.slane %v202_v10, %v206_v9  ;;  %v215_v17 = vrot.slane %v202_v10, %v214_v12  ;;  %v211_v18 = vrot.slane %v202_v10, %v210_v13  ;;  %v593_v50 = vld [vmem:[%s1454_s4] sm:$0xff]  ;;  %v595_v57 = vld [vmem:[%s1454_s4 + $0x10] sm:$0xff]  ;;  %v596_v58 = vld [vmem:[%s1454_s4 + $0x18] sm:$0xff] }
  0x24   :  { %959 = vmatpush1.bf16.msra.mxu1 %v958_v31  ;;  %v477_v31 = vand.u32 1, %v1317_v33  ;;  %v597_v62 = vld [vmem:[%s1454_s4 + $0x20] sm:$0xff]  ;;  %v598_v63 = vld [vmem:[%s1454_s4 + $0x28] sm:$0xff]  ;;  %v604_v8 = vld [vmem:[%s1454_s4 + $0x58] sm:$0xff] }
  0x25   :  { %961 = vmatprep.subr.bf16.mxu1 %v960_v56  ;;  %v605_v10 = vld [vmem:[%s1454_s4 + $0x60] sm:$0xff]  ;;  %v607_v13 = vld [vmem:[%s1454_s4 + $0x70] sm:$0xff] }
  0x26   :  { %vm485_vm4 = vcmp.eq.s32.totalorder %v453_v32, %v477_v31 }
  0x28   :  { %963 = vmatpush1.bf16.msra.mxu1 %v962_v61  ;;  %v1008_v61 = vpack.c.bf16 %v596_v58, %v595_v57 }
  0x81   :  { %v31_v37 = vpop.permute.xlu0 %30 }
  0x82   :  { %vm35_vm0 = vcmp.eq.s32.totalorder %v31_v37, %v1317_v33  ;;  %vm36_vm1 = vcmp.eq.s32.totalorder %v31_v37, %v28_v34 }
  0x83   :  { %725 = vmatprep.mubr.msk.f32.mxu0 %vm36_vm1, %v1084_v39 }
  0x84   :  { %726 = vmatmul.mubr.msk.f32.vlgmr.msra.gmra.mrb[0].mxu0 %vm35_vm0, %v1084_v39 }
  0x85   :  { %v34_v42 = vpop.permute.xlu0 %33  ;;  %967 = vmatpush3.bf16.msra.mxu0 %v964_v26 }
  0x86   :  { %vm37_vm2 = vcmp.eq.s32.totalorder %v34_v42, %v1317_v33  ;;  %vm38_vm3 = vcmp.eq.s32.totalorder %v34_v42, %v28_v34  ;;  %969 = vmatprep.subr.bf16.mxu0 %v968_v38  ;;  %v460_v34 = vand.u32 1, %v448_v30 }
  0x87   :  { %727 = vmatprep.mubr.msk.f32.mxu0 %vm38_vm3, %v1084_v39 }
  0x88   :  { %728 = vmatmul.mubr.msk.f32.gmra.mrb[2].mxu0 %vm37_vm2, %v1084_v39  ;;  %vm486_vm6 = vcmp.eq.s32.totalorder %v460_v34, %v477_v31 }
  0x89   :  { %971 = vmatpush3.bf16.msra.mxu0 %v968_v38 }
  0x8a   :  { %973 = vmatprep.subr.bf16.mxu0 %v972_v43 }
  0x8d   :  { %975 = vmatpush3.bf16.msra.mxu0 %v972_v43 }
  0x8e   :  { %977 = vmatprep.subr.bf16.mxu0 %v976_v46 }
  0x91   :  { %979 = vmatpush3.bf16.msra.mxu0 %v976_v46 }
  0x92   :  { %981 = vmatprep.subr.bf16.mxu0 %v980_v49 }
  0x95   :  { %983 = vmatpush3.bf16.msra.mxu0 %v980_v49 }
  0x96   :  { %985 = vmatprep.subr.bf16.mxu0 %v984_v52 }
  0x99   :  { %987 = vmatpush3.bf16.msra.mxu0 %v984_v52  ;;  %v1004_v52 = vpack.c.bf16 %v594_v51, %v593_v50 }
  0x9a   :  { %989 = vmatprep.subr.bf16.mxu0 %v988_v60 }
  0x9d   :  { %991 = vmatpush3.bf16.msra.mxu0 %v988_v60 }
  0x9e   :  { %993 = vmatprep.subr.bf16.mxu0 %v992_v0 }
  0xa1   :  { %995 = vmatpush3.bf16.msra.mxu0 %v992_v0  ;;  %v1012_v0 = vpack.c.bf16 %v598_v63, %v597_v62 }
 0x157   :  { %v766_v2 = vpop.f32.mrb[0].mxu0 }
 0x158   :  { %v767_v3 = vpop.f32.mrb[1].mxu0 }
 0x159   :  { %v768_v4 = vadd.f32 %v767_v3, %v766_v2  ;;  %v600_v2 = vld [vmem:[%s1454_s4 + $0x38] sm:$0xff] }
 0x15b   :  { %v769_v5 = vpop.f32.mrb[2].mxu0  ;;  %284 = vmatmul.mubr.f32.vlgmr.msra.gmra.mrb[0].mxu1 %v768_v4  ;;  %848 = vmatprep.mubr.f32.mxu0 %v768_v4  ;;  %v601_v4 = vld [vmem:[%s1454_s4 + $0x40] sm:$0xff] }
 0x15c   :  { %v770_v6 = vpop.f32.mrb[3].mxu0  ;;  %289 = vmatprep.mubr.f32.mxu1 %v1085_v1  ;;  %v599_v1 = vld [vmem:[%s1454_s4 + $0x30] sm:$0xff] }
 0x15d   :  { %v771_v7 = vadd.f32 %v770_v6, %v769_v5  ;;  %v1016_v3 = vpack.c.bf16 %v600_v2, %v599_v1  ;;  %v602_v5 = vld [vmem:[%s1454_s4 + $0x48] sm:$0xff] }
 0x15e   :  { %v1020_v6 = vpack.c.bf16 %v602_v5, %v601_v4 }
 0x15f   :  { %290 = vmatmul.mubr.f32.gmra.mrb[2].mxu1 %v771_v7  ;;  %849 = vmatmul.mubr.f32.vlgmr.msra.gmra.mrb[4].mxu0 %v771_v7  ;;  %v603_v7 = vld [vmem:[%s1454_s4 + $0x50] sm:$0xff] }
 0x160   :  { %v1024_v9 = vpack.c.bf16 %v604_v8, %v603_v7 }
 0x22e   :  { %v285_v14 = vpop.f32.mrb[0].mxu1 }
 0x22f   :  { %v286_v15 = vadd.f32 %v285_v14, %v207_v11  ;;  %v287_v16 = vpop.f32.mrb[1].mxu1  ;;  %v608_v14 = vld [vmem:[%s1454_s4 + $0x78] sm:$0xff] }
 0x230   :  { %v288_v24 = vadd.f32 %v287_v16, %v211_v18 }
 0x231   :  { %855 = vmatprep.mubr.f32.mxu0 %v286_v15  ;;  %v1032_v15 = vpack.c.bf16 %v608_v14, %v607_v13 }
 0x232   :  { %v291_v19 = vpop.f32.mrb[2].mxu1  ;;  %v850_v20 = vpop.f32.mrb[4].mxu0 }
 0x233   :  { %v368_v21 = vadd.f32 %v850_v20, %v215_v17  ;;  %v293_v22 = vpop.f32.mrb[3].mxu1  ;;  %v362_v23 = vpop.f32.mrb[5].mxu0  ;;  %v292_v29 = vadd.f32 %v291_v19, %v207_v11  ;;  %v606_v11 = vld [vmem:[%s1454_s4 + $0x68] sm:$0xff]  ;;  %s1086_s4 = smov [#allocation2]  }
 0x234   :  { %v294_v25 = vadd.f32 %v293_v22, %v211_v18  ;;  %v363_v26 = vadd.f32 %v362_v23, %v215_v17  ;;  %v1028_v12 = vpack.c.bf16 %v606_v11, %v605_v10  ;;  %v731_v18 = vld [vmem:[%s1455_s5] ss:$0 sm:$0xff]  ;;  %s710_s14 = sshll.u32 %s1086_s4, 4  ;;  %s711_s14 = int_to_ptr.vmem [resolvable:$true] %s710_s14 }
 0x235   :  { %s1059_s5 = scalar_lea.vmem %s711_s14, 256  ;;  %p1064_p1 = scmp.lt.s32.totalorder %s711_s14, %s711_s14 }
 0x236   :  { %v996_v27 = vpack.c.bf16 %v294_v25, %v288_v24  ;;  %v1000_v28 = vpack.c.bf16 %v368_v21, %v363_v26  ;;  %p1060_p0 = scmp.ne.s32.totalorder %s711_s14, %s1059_s5  ;;  %p1065_p2 = scmp.lt.s32.totalorder %s1059_s5, %s1059_s5 }
 0x238   :  { %997 = vmatprep.subr.bf16.mxu0 %v996_v27  ;;  %1001 = vmatprep.subr.bf16.mxu1 %v1000_v28  ;;  %p1066_p3 = por %p1065_p2, %p1064_p1 }
 0x239   :  { %999 = vmatpush3.bf16.xpose.msra.mxu0 %v996_v27  ;;  %1003 = vmatpush3.bf16.msra.mxu1 %v1000_v28 }
 0x23a   :  { %1005 = vmatprep.subr.bf16.mxu1 %v1004_v52  ;;  %p1067_p4 = pnand %p1066_p3, %p1060_p0 }
 0x240   :  { %856 = vmatmul.mubr.f32.vlgmr.msra.gmra.mrb[6].mxu0 %v292_v29 }
 0x313   :  { %v857_v35 = vpop.f32.mrb[6].mxu0 }
 0x314   :  { %v437_v36 = vpop.f32.mrb[7].mxu0  ;;  %v488_v39 = vsel %vm486_vm6, %v857_v35, -1e+30 }
 0x315   :  { %v487_v37 = vsel %vm485_vm4, %v437_v36, -1e+30  ;;  %v493_v40 = vsel %vm489_vm5, %v488_v39, -inf }
 0x316   :  { %v490_v38 = vsel %vm489_vm5, %v487_v37, -inf }
 0x317   :  { %491 = vmax.xlane.f32.xlu1 %v490_v38 }
 0x31b   :  { %494 = vmax.xlane.f32.xlu1 %v493_v40 }
 0x3a4   :  { %v492_v41 = vpop.xlane.xlu1 %491 }
 0x3a5   :  { %v496_v42 = vsub.f32 %v487_v37, %v492_v41 }
 0x3a7   :  { %v498_v43 = vmul.f32 1.442695, %v496_v42 }
 0x3a8   :  { %v495_v44 = vpop.xlane.xlu1 %494 }
 0x3a9   :  { %1043 = vpow2.f32 %v498_v43  ;;  %v497_v33 = vsub.f32 %v488_v39, %v495_v44 }
 0x3ab   :  { %v500_v45 = vmul.f32 1.442695, %v497_v33 }
 0x3ad   :  { %1045 = vpow2.f32 %v500_v45 }
 0x3b3   :  { %v1044_v46 = vpop.eup %1043 }
 0x3b4   :  { %v502_v47 = vsel %vm489_vm5, %v1044_v46, 0.0 }
 0x3b5   :  { %503 = vadd.xlane.f32.xlu0 %v502_v47 }
 0x3b7   :  { %v1046_v48 = vpop.eup %1045 }
 0x3b8   :  { %v505_v49 = vsel %vm489_vm5, %v1046_v48, 0.0 }
 0x3b9   :  { %506 = vadd.xlane.f32.xlu1 %v505_v49 }
 0x442   :  { %v504_v53 = vpop.xlane.xlu0 %503 }
 0x443   :  { %1047 = vrcp.f32 %v504_v53 }
 0x446   :  { %v507_v54 = vpop.xlane.xlu1 %506 }
 0x447   :  { %1049 = vrcp.f32 %v507_v54 }
 0x44d   :  { %v1048_v55 = vpop.eup %1047 }
 0x44e   :  { %v510_v56 = vmul.f32 %v1048_v55, %v1044_v46 }
 0x450   :  { %862 = vmatprep.mubr.msk.f32.mxu1 %vm489_vm5, %v510_v56 }
 0x451   :  { %v1050_v59 = vpop.eup %1049 }
 0x452   :  { %v511_v60 = vmul.f32 %v1050_v59, %v1046_v48 }
 0x454   :  { %863 = vmatmul.mubr.msk.f32.vlgmr.msra.gmra.mrb[4].mxu1 %vm489_vm5, %v511_v60 }
 0x455   :  { %1007 = vmatpush3.bf16.msra.mxu1 %v1004_v52 }
 0x456   :  { %1009 = vmatprep.subr.bf16.mxu1 %v1008_v61 }
 0x459   :  { %1011 = vmatpush3.bf16.msra.mxu1 %v1008_v61 }
 0x45a   :  { %1013 = vmatprep.subr.bf16.mxu1 %v1012_v0 }
 0x45d   :  { %1015 = vmatpush3.bf16.msra.mxu1 %v1012_v0 }
 0x45e   :  { %1017 = vmatprep.subr.bf16.mxu1 %v1016_v3 }
 0x461   :  { %1019 = vmatpush3.bf16.msra.mxu1 %v1016_v3 }
 0x462   :  { %1021 = vmatprep.subr.bf16.mxu1 %v1020_v6 }
 0x465   :  { %1023 = vmatpush3.bf16.msra.mxu1 %v1020_v6 }
 0x466   :  { %1025 = vmatprep.subr.bf16.mxu1 %v1024_v9 }
 0x469   :  { %1027 = vmatpush3.bf16.msra.mxu1 %v1024_v9 }
 0x46a   :  { %1029 = vmatprep.subr.bf16.mxu1 %v1028_v12 }
 0x46d   :  { %1031 = vmatpush3.bf16.msra.mxu1 %v1028_v12 }
 0x46e   :  { %1033 = vmatprep.subr.bf16.mxu1 %v1032_v15 }
 0x471   :  { %1035 = vmatpush3.bf16.msra.mxu1 %v1032_v15 }
 0x527   :  { %v864_v16 = vpop.f32.mrb[4].mxu1 }
 0x528   :  { %v584_v17 = vpop.f32.mrb[5].mxu1 }
 0x529   :  { %897 = vmatprep.mubr.f32.mxu1 %v584_v17 }
 0x52a   :  { %898 = vmatmul.mubr.f32.vlgmr.msra.gmra.mrb[6].mxu1 %v864_v16 }
 0x5fd   :  { %v899_v19 = vpop.f32.mrb[6].mxu1 }
 0x5fe   :  { %v688_v20 = vadd.f32 %v899_v19, %v731_v18  ;;  %v682_v21 = vpop.f32.mrb[7].mxu1 }
 0x5ff   :  { %v683_v22 = vadd.f32 %v731_v18, %v682_v21 }
 0x600   :  { %v733_v23 = vmul.f32 -1.442695, %v688_v20 }
 0x601   :  { %v732_v24 = vmul.f32 -1.442695, %v683_v22 }
 0x602   :  { %1051 = vpow2.f32 %v733_v23 }
 0x603   :  { %1053 = vpow2.f32 %v732_v24 }
 0x60c   :  { %v1052_v25 = vpop.eup %1051 }
 0x60d   :  { %v1054_v26 = vpop.eup %1053  ;;  %v698_v27 = vadd.f32 1.0, %v1052_v25 }
 0x60e   :  { %v697_v28 = vadd.f32 1.0, %v1054_v26 }
 0x60f   :  { %1055 = vrcp.f32 %v698_v27 }
 0x610   :  { %1057 = vrcp.f32 %v697_v28 }
 0x619   :  { %v1056_v29 = vpop.eup %1055 }
 0x61a   :  { %v1058_v30 = vpop.eup %1057  ;;  %704 = vst [vmem:[#allocation2 + $0x8] sm:$0xff] %v1056_v29 }
 0x61b   :  { %703 = vst [vmem:[#allocation2] sm:$0xff] %v1058_v30 }
 0x61c   :  { %1070 = shalt.err (!%p1067_p4)
}
 0x61d   :  { %s1071_s16 = scalar_lea.hbm %s1456_s6, 256 }
 0x61e   :  { %p1072_p5 = scmp.ne.s32.totalorder %s1456_s6, %s1071_s16  ;;  %p1075_p6 = scmp.lt.u32.totalorder %s1071_s16, %s1456_s6 }
 0x620   :  { %p1077_p7 = pnand %p1075_p6, %p1072_p5 }
 0x622   :  { %1080 = shalt.err (!%p1077_p7)
}
 0x623   :  { %s1087_s21 = smov 128   ;;  %s1088_s22 = smov 8  }
 0x624   :  { %716 = dma.vmem_to_hbm [thread:$0]  %s711_s14, 256, %s1456_s6, [#allocation3], %s1087_s21, %s1087_s21, %s1088_s22  }
 0x625   :  { %1081 = dma.done.wait [#allocation3], 256  }
 0x626   :  { %1082 = vsyncadd [#allocation3], 4294967040 }
 0x627   :  { %720 = vsyncpa [#allocation3], 1 }

</bundles_post_ra>
